<compile_context>
chip_gen: v6e
topology: v6e:2x2x1
jax: 0.10.0
libtpu: 0.0.40
codegen_flags: <defaults>
</compile_context>

<pallas_src>
import jax
import jax.numpy as jnp
from jax.experimental import pallas as pl
from jax.experimental.pallas import tpu as pltpu

BN_EPS = 1e-5


def _choose_s_tile(S, max_tile=2048):
    """Largest multiple of 128 that divides S (capped), else the full extent S."""
    cap = min(max_tile, (S // 128) * 128)
    for t in range(cap, 0, -128):
        if S % t == 0:
            return t
    return S


def _pool_conv_relu_stats_kernel(xw_ref, w_ref, b_ref, y_ref, sum_ref, ssq_ref):
    # xw_ref : (1, 8, Cin, St)   8 = flattened 2x2x2 pooling window, St = lane tile
    # w_ref  : (Cout, Cin)       1x1x1 conv weight (VMEM-resident)
    # b_ref  : (Cout, 1)         conv bias (VMEM-resident)
    # y_ref  : (1, Cout, St)     un-normalized relu(conv(pool(x)))
    # sum_ref, ssq_ref : (1, Cout, 1)  per-channel BN partial stats, accumulated over s
    s_idx = pl.program_id(1)

    @pl.when(s_idx == 0)
    def _init():
        sum_ref[...] = jnp.zeros_like(sum_ref)
        ssq_ref[...] = jnp.zeros_like(ssq_ref)

    xw = xw_ref[0]                              # (8, Cin, St)
    pooled = jnp.max(xw, axis=0)                # (Cin, St)  MaxPool3d(2,2,2)

    # 1x1x1 conv as a Cin-step VPU multiply-accumulate (skip the MXU: K = Cin tiny).
    w = w_ref[...]                              # (Cout, Cin)
    cin = w.shape[1]
    acc = w[:, 0:1] * pooled[0:1, :]            # (Cout, St)
    for c in range(1, cin):
        acc = acc + w[:, c:c + 1] * pooled[c:c + 1, :]

    y = jnp.maximum(acc + b_ref[...], 0.0)      # bias + ReLU, (Cout, St)
    y_ref[0] = y

    # BatchNorm batch-statistic partials (per channel, reduced over the lane axis).
    sum_ref[0] = sum_ref[0] + jnp.sum(y, axis=1, keepdims=True)
    ssq_ref[0] = ssq_ref[0] + jnp.sum(y * y, axis=1, keepdims=True)


def _bn_apply_kernel(y_ref, scale_ref, shift_ref, o_ref):
    # y_ref / o_ref: (1, Cout, St); scale/shift: (Cout, 1) (VMEM-resident)
    o_ref[...] = y_ref[...] * scale_ref[...] + shift_ref[...]


def downsampler_forward(x, conv_w, conv_b, bn_gamma, bn_beta):
    """x: (N, Cin, D, H, W) float32 (NCDHW). Returns (N, Cout, D/2, H/2, W/2) float32."""
    N, Cin, D, H, W = x.shape
    Cout = conv_w.shape[0]
    assert D % 2 == 0 and H % 2 == 0 and W % 2 == 0
    Dp, Hp, Wp = D // 2, H // 2, W // 2
    S = Dp * Hp * Wp
    St = _choose_s_tile(S)
    ns = S // St
    grid = (N, ns)

    # ---- glue: single fused rearrangement (one HBM pass) ----
    # (N, Cin, D, H, W) -> (N, 8, Cin, S); axis 1 enumerates the 2x2x2 window and S stays
    # in row-major (Dp, Hp, Wp) order so the kernel output reshapes to NCDHW for free.
    # TODO(synk): reading 2x2x2 windows straight out of NCDHW inside the kernel (strided
    # lane loads) would remove this remaining pre-pass as well.
    xw = x.reshape(N, Cin, Dp, 2, Hp, 2, Wp, 2)
    xw = jnp.transpose(xw, (0, 3, 5, 7, 1, 2, 4, 6))        # (N,2,2,2,Cin,Dp,Hp,Wp)
    xw = xw.reshape(N, 8, Cin, S)

    wk = conv_w.reshape(Cout, Cin).astype(jnp.float32)
    bk = conv_b.reshape(Cout, 1).astype(jnp.float32)

    # ---- phase 1: maxpool + conv + relu + BN-stat accumulation ----
    y, psum, pssq = pl.pallas_call(
        _pool_conv_relu_stats_kernel,
        out_shape=(
            jax.ShapeDtypeStruct((N, Cout, S), jnp.float32),
            jax.ShapeDtypeStruct((N, Cout, 1), jnp.float32),
            jax.ShapeDtypeStruct((N, Cout, 1), jnp.float32),
        ),
        grid=grid,
        in_specs=[
            pl.BlockSpec((1, 8, Cin, St), lambda n, s: (n, 0, 0, s)),
            pl.BlockSpec((Cout, Cin), lambda n, s: (0, 0)),      # resident
            pl.BlockSpec((Cout, 1), lambda n, s: (0, 0)),        # resident
        ],
        out_specs=(
            pl.BlockSpec((1, Cout, St), lambda n, s: (n, 0, s)),
            pl.BlockSpec((1, Cout, 1), lambda n, s: (n, 0, 0)),  # revisited accumulator
            pl.BlockSpec((1, Cout, 1), lambda n, s: (n, 0, 0)),  # revisited accumulator
        ),
        compiler_params=pltpu.CompilerParams(
            dimension_semantics=("parallel", "arbitrary")),
    )(xw, wk, bk)

    # ---- tiny per-channel BN math (training mode, biased variance, eps=1e-5) ----
    # NOTE: sum/sumsq in f32 is fine at these sizes; for huge M prefer Welford/Chan.
    # TODO(synk): running_mean/running_var buffers of nn.BatchNorm3d are not updated
    # (forward output only).
    m_total = jnp.float32(N * S)
    mean = jnp.sum(psum, axis=0) / m_total                    # (Cout, 1)
    ex2 = jnp.sum(pssq, axis=0) / m_total                     # (Cout, 1)
    var = jnp.maximum(ex2 - mean * mean, 0.0)
    inv = jax.lax.rsqrt(var + BN_EPS)
    scale = bn_gamma.reshape(Cout, 1).astype(jnp.float32) * inv
    shift = bn_beta.reshape(Cout, 1).astype(jnp.float32) - mean * scale

    # ---- phase 2: apply normalization (elementwise, lane-dense) ----
    out = pl.pallas_call(
        _bn_apply_kernel,
        out_shape=jax.ShapeDtypeStruct((N, Cout, S), jnp.float32),
        grid=grid,
        in_specs=[
            pl.BlockSpec((1, Cout, St), lambda n, s: (n, 0, s)),
            pl.BlockSpec((Cout, 1), lambda n, s: (0, 0)),        # resident
            pl.BlockSpec((Cout, 1), lambda n, s: (0, 0)),        # resident
        ],
        out_specs=pl.BlockSpec((1, Cout, St), lambda n, s: (n, 0, s)),
        compiler_params=pltpu.CompilerParams(
            dimension_semantics=("parallel", "parallel")),
    )(y, scale, shift)

    return out.reshape(N, Cout, Dp, Hp, Wp)                   # free reshape, NCDHW


def reference_forward(x, conv_w, conv_b, bn_gamma, bn_beta):
    """Pure-JAX reference mirroring the PyTorch forward (training-mode BN)."""
    N, Cin, D, H, W = x.shape
    Cout = conv_w.shape[0]
    Dp, Hp, Wp = D // 2, H // 2, W // 2
    xp = x.reshape(N, Cin, Dp, 2, Hp, 2, Wp, 2).max(axis=(3, 5, 7))   # maxpool
    y = jnp.einsum('ncdhw,oc->nodhw', xp, conv_w.reshape(Cout, Cin))
    y = y + conv_b[None, :, None, None, None]
    y = jnp.maximum(y, 0.0)
    mean = y.mean(axis=(0, 2, 3, 4), keepdims=True)
    var = ((y - mean) ** 2).mean(axis=(0, 2, 3, 4), keepdims=True)
    y_hat = (y - mean) * jax.lax.rsqrt(var + BN_EPS)
    return bn_gamma[None, :, None, None, None] * y_hat + \
        bn_beta[None, :, None, None, None]


if __name__ == "__main__":
    key = jax.random.PRNGKey(0)
    k_x, k_w, k_b, k_g, k_be = jax.random.split(key, 5)

    N, Cin, Cout, D, H, W = 2, 4, 8, 16, 16, 16
    x = jax.random.normal(k_x, (N, Cin, D, H, W), dtype=jnp.float32)

    # Parameter shapes from nn.Conv3d(Cin, Cout, 1) + nn.BatchNorm3d(Cout)
    conv_w = 0.1 * jax.random.normal(k_w, (Cout, Cin, 1, 1, 1), dtype=jnp.float32)
    conv_b = 0.05 * jax.random.normal(k_b, (Cout,), dtype=jnp.float32)
    bn_gamma = 1.0 + 0.1 * jax.random.normal(k_g, (Cout,), dtype=jnp.float32)
    bn_beta = 0.1 * jax.random.normal(k_be, (Cout,), dtype=jnp.float32)

    out = downsampler_forward(x, conv_w, conv_b, bn_gamma, bn_beta)
    out = jax.block_until_ready(out)

    ref = reference_forward(x, conv_w, conv_b, bn_gamma, bn_beta)
    assert out.shape == (N, Cout, D // 2, H // 2, W // 2), out.shape
    assert jnp.allclose(out, ref, rtol=1e-4, atol=1e-4), \
        float(jnp.max(jnp.abs(out - ref)))

    print("KERNEL_OK")
</pallas_src>

<mosaic_0001>
module attributes {stable_mosaic.version = 11 : i64} {
  func.func @_pool_conv_relu_stats_kernel(%arg0: i32, %arg1: i32, %arg2: memref<1x8x4x512xf32, #tpu.memory_space<vmem>>, %arg3: memref<8x4xf32, #tpu.memory_space<vmem>>, %arg4: memref<8x1xf32, #tpu.memory_space<vmem>>, %arg5: memref<1x8x512xf32, #tpu.memory_space<vmem>>, %arg6: memref<1x8x1xf32, #tpu.memory_space<vmem>>, %arg7: memref<1x8x1xf32, #tpu.memory_space<vmem>>) attributes {dimension_semantics = [#tpu.dimension_semantics<parallel>, #tpu.dimension_semantics<arbitrary>], iteration_bounds = array<i64: 2, 1>, scalar_prefetch = 0 : i64, scratch_operands = 0 : i64, tpu.core_type = #tpu.core_type<tc>, window_params = [{transform_indices = @transform_0, window_bounds = array<i64: 1, 8, 4, 512>}, {pipeline_mode = #tpu.pipeline_mode<synchronous>, transform_indices = @transform_1, window_bounds = array<i64: 8, 4>}, {pipeline_mode = #tpu.pipeline_mode<synchronous>, transform_indices = @transform_2, window_bounds = array<i64: 8, 1>}, {transform_indices = @transform_3, window_bounds = array<i64: 1, 8, 512>}, {transform_indices = @transform_4, window_bounds = array<i64: 1, 8, 1>}, {transform_indices = @transform_5, window_bounds = array<i64: 1, 8, 1>}]} {
    %c0_i32 = arith.constant 0 : i32
    %0 = arith.cmpi eq, %arg1, %c0_i32 : i32
    %1 = arith.extui %0 : i1 to i32
    %c0_i32_0 = arith.constant 0 : i32
    %2 = arith.cmpi ne, %1, %c0_i32_0 : i32
    scf.if %2 {
      %cst_26 = arith.constant 0.000000e+00 : f32
      %55 = vector.broadcast %cst_26 : f32 to vector<1x8x1xf32>
      %c0_27 = arith.constant 0 : index
      %c0_28 = arith.constant 0 : index
      %c0_29 = arith.constant 0 : index
      %56 = vector.load %arg6[%c0_27, %c0_28, %c0_29] : memref<1x8x1xf32, #tpu.memory_space<vmem>>, vector<1x8x1xf32>
      tpu.vector_store %arg6[%c0_27, %c0_28, %c0_29], %55 {strides = array<i32>} : memref<1x8x1xf32, #tpu.memory_space<vmem>>, vector<1x8x1xf32>,
      %cst_30 = arith.constant 0.000000e+00 : f32
      %57 = vector.broadcast %cst_30 : f32 to vector<1x8x1xf32>
      %c0_31 = arith.constant 0 : index
      %c0_32 = arith.constant 0 : index
      %c0_33 = arith.constant 0 : index
      %58 = vector.load %arg7[%c0_31, %c0_32, %c0_33] : memref<1x8x1xf32, #tpu.memory_space<vmem>>, vector<1x8x1xf32>
      tpu.vector_store %arg7[%c0_31, %c0_32, %c0_33], %57 {strides = array<i32>} : memref<1x8x1xf32, #tpu.memory_space<vmem>>, vector<1x8x1xf32>,
    } else {
    }
    %c0 = arith.constant 0 : index
    %c0_1 = arith.constant 0 : index
    %c0_2 = arith.constant 0 : index
    %c0_3 = arith.constant 0 : index
    %3 = vector.load %arg2[%c0, %c0_1, %c0_2, %c0_3] : memref<1x8x4x512xf32, #tpu.memory_space<vmem>>, vector<1x8x4x512xf32>
    %4 = vector.shape_cast %3 : vector<1x8x4x512xf32> to vector<8x4x512xf32>
    %cst = arith.constant dense<0xFF800000> : vector<4x512xf32>
    %5 = vector.multi_reduction <maximumf>, %4, %cst [0] : vector<8x4x512xf32> to vector<4x512xf32>
    %c0_4 = arith.constant 0 : index
    %c0_5 = arith.constant 0 : index
    %6 = vector.load %arg3[%c0_4, %c0_5] : memref<8x4xf32, #tpu.memory_space<vmem>>, vector<8x4xf32>
    %7 = vector.extract_strided_slice %6 {offsets = [0, 0], sizes = [8, 1], strides = [1, 1]} : vector<8x4xf32> to vector<8x1xf32>
    %8 = vector.extract_strided_slice %5 {offsets = [0, 0], sizes = [1, 512], strides = [1, 1]} : vector<4x512xf32> to vector<1x512xf32>
    %9 = vector.broadcast %7 : vector<8x1xf32> to vector<8x512xf32>
    %10 = vector.broadcast %8 : vector<1x512xf32> to vector<8x512xf32>
    %11 = arith.mulf %9, %10 : vector<8x512xf32>
    %12 = vector.extract_strided_slice %6 {offsets = [0, 1], sizes = [8, 1], strides = [1, 1]} : vector<8x4xf32> to vector<8x1xf32>
    %13 = vector.extract_strided_slice %5 {offsets = [1, 0], sizes = [1, 512], strides = [1, 1]} : vector<4x512xf32> to vector<1x512xf32>
    %14 = vector.broadcast %12 : vector<8x1xf32> to vector<8x512xf32>
    %15 = vector.broadcast %13 : vector<1x512xf32> to vector<8x512xf32>
    %16 = arith.mulf %14, %15 : vector<8x512xf32>
    %17 = arith.addf %11, %16 : vector<8x512xf32>
    %18 = vector.extract_strided_slice %6 {offsets = [0, 2], sizes = [8, 1], strides = [1, 1]} : vector<8x4xf32> to vector<8x1xf32>
    %19 = vector.extract_strided_slice %5 {offsets = [2, 0], sizes = [1, 512], strides = [1, 1]} : vector<4x512xf32> to vector<1x512xf32>
    %20 = vector.broadcast %18 : vector<8x1xf32> to vector<8x512xf32>
    %21 = vector.broadcast %19 : vector<1x512xf32> to vector<8x512xf32>
    %22 = arith.mulf %20, %21 : vector<8x512xf32>
    %23 = arith.addf %17, %22 : vector<8x512xf32>
    %24 = vector.extract_strided_slice %6 {offsets = [0, 3], sizes = [8, 1], strides = [1, 1]} : vector<8x4xf32> to vector<8x1xf32>
    %25 = vector.extract_strided_slice %5 {offsets = [3, 0], sizes = [1, 512], strides = [1, 1]} : vector<4x512xf32> to vector<1x512xf32>
    %26 = vector.broadcast %24 : vector<8x1xf32> to vector<8x512xf32>
    %27 = vector.broadcast %25 : vector<1x512xf32> to vector<8x512xf32>
    %28 = arith.mulf %26, %27 : vector<8x512xf32>
    %29 = arith.addf %23, %28 : vector<8x512xf32>
    %c0_6 = arith.constant 0 : index
    %c0_7 = arith.constant 0 : index
    %30 = vector.load %arg4[%c0_6, %c0_7] : memref<8x1xf32, #tpu.memory_space<vmem>>, vector<8x1xf32>
    %31 = vector.broadcast %30 : vector<8x1xf32> to vector<8x512xf32>
    %32 = arith.addf %29, %31 : vector<8x512xf32>
    %cst_8 = arith.constant 0.000000e+00 : f32
    %33 = vector.broadcast %cst_8 : f32 to vector<8x512xf32>
    %34 = arith.maximumf %32, %33 : vector<8x512xf32>
    %c0_9 = arith.constant 0 : index
    %c0_10 = arith.constant 0 : index
    %c0_11 = arith.constant 0 : index
    %35 = vector.load %arg5[%c0_9, %c0_10, %c0_11] : memref<1x8x512xf32, #tpu.memory_space<vmem>>, vector<1x8x512xf32>
    %36 = vector.shape_cast %35 : vector<1x8x512xf32> to vector<8x512xf32>
    %37 = vector.shape_cast %34 : vector<8x512xf32> to vector<1x8x512xf32>
    tpu.vector_store %arg5[%c0_9, %c0_10, %c0_11], %37 {strides = array<i32>} : memref<1x8x512xf32, #tpu.memory_space<vmem>>, vector<1x8x512xf32>,
    %c0_12 = arith.constant 0 : index
    %c0_13 = arith.constant 0 : index
    %c0_14 = arith.constant 0 : index
    %38 = vector.load %arg6[%c0_12, %c0_13, %c0_14] : memref<1x8x1xf32, #tpu.memory_space<vmem>>, vector<1x8x1xf32>
    %39 = vector.shape_cast %38 : vector<1x8x1xf32> to vector<8x1xf32>
    %cst_15 = arith.constant dense<0.000000e+00> : vector<8xf32>
    %40 = vector.multi_reduction <add>, %34, %cst_15 [1] : vector<8x512xf32> to vector<8xf32>
    %41 = vector.shape_cast %40 : vector<8xf32> to vector<8x1xf32>
    %42 = arith.addf %39, %41 : vector<8x1xf32>
    %c0_16 = arith.constant 0 : index
    %c0_17 = arith.constant 0 : index
    %c0_18 = arith.constant 0 : index
    %43 = vector.load %arg6[%c0_16, %c0_17, %c0_18] : memref<1x8x1xf32, #tpu.memory_space<vmem>>, vector<1x8x1xf32>
    %44 = vector.shape_cast %43 : vector<1x8x1xf32> to vector<8x1xf32>
    %45 = vector.shape_cast %42 : vector<8x1xf32> to vector<1x8x1xf32>
    tpu.vector_store %arg6[%c0_16, %c0_17, %c0_18], %45 {strides = array<i32>} : memref<1x8x1xf32, #tpu.memory_space<vmem>>, vector<1x8x1xf32>,
    %c0_19 = arith.constant 0 : index
    %c0_20 = arith.constant 0 : index
    %c0_21 = arith.constant 0 : index
    %46 = vector.load %arg7[%c0_19, %c0_20, %c0_21] : memref<1x8x1xf32, #tpu.memory_space<vmem>>, vector<1x8x1xf32>
    %47 = vector.shape_cast %46 : vector<1x8x1xf32> to vector<8x1xf32>
    %48 = arith.mulf %34, %34 : vector<8x512xf32>
    %cst_22 = arith.constant dense<0.000000e+00> : vector<8xf32>
    %49 = vector.multi_reduction <add>, %48, %cst_22 [1] : vector<8x512xf32> to vector<8xf32>
    %50 = vector.shape_cast %49 : vector<8xf32> to vector<8x1xf32>
    %51 = arith.addf %47, %50 : vector<8x1xf32>
    %c0_23 = arith.constant 0 : index
    %c0_24 = arith.constant 0 : index
    %c0_25 = arith.constant 0 : index
    %52 = vector.load %arg7[%c0_23, %c0_24, %c0_25] : memref<1x8x1xf32, #tpu.memory_space<vmem>>, vector<1x8x1xf32>
    %53 = vector.shape_cast %52 : vector<1x8x1xf32> to vector<8x1xf32>
    %54 = vector.shape_cast %51 : vector<8x1xf32> to vector<1x8x1xf32>
    tpu.vector_store %arg7[%c0_23, %c0_24, %c0_25], %54 {strides = array<i32>} : memref<1x8x1xf32, #tpu.memory_space<vmem>>, vector<1x8x1xf32>,
    return
  }
  func.func @transform_0(%arg0: i32, %arg1: i32) -> (i32, i32, i32, i32) {
    %c0_i32 = arith.constant 0 : i32
    %c0_i32_0 = arith.constant 0 : i32
    %c0_i32_1 = arith.constant 0 : i32
    return %arg0, %c0_i32, %c0_i32_0, %arg1 : i32, i32, i32, i32
  }
  func.func @transform_1(%arg0: i32, %arg1: i32) -> (i32, i32) {
    %c0_i32 = arith.constant 0 : i32
    %c0_i32_0 = arith.constant 0 : i32
    %c0_i32_1 = arith.constant 0 : i32
    return %c0_i32, %c0_i32_0 : i32, i32
  }
  func.func @transform_2(%arg0: i32, %arg1: i32) -> (i32, i32) {
    %c0_i32 = arith.constant 0 : i32
    %c0_i32_0 = arith.constant 0 : i32
    %c0_i32_1 = arith.constant 0 : i32
    return %c0_i32, %c0_i32_0 : i32, i32
  }
  func.func @transform_3(%arg0: i32, %arg1: i32) -> (i32, i32, i32) {
    %c0_i32 = arith.constant 0 : i32
    %c0_i32_0 = arith.constant 0 : i32
    return %arg0, %c0_i32, %arg1 : i32, i32, i32
  }
  func.func @transform_4(%arg0: i32, %arg1: i32) -> (i32, i32, i32) {
    %c0_i32 = arith.constant 0 : i32
    %c0_i32_0 = arith.constant 0 : i32
    %c0_i32_1 = arith.constant 0 : i32
    return %arg0, %c0_i32, %c0_i32_0 : i32, i32, i32
  }
  func.func @transform_5(%arg0: i32, %arg1: i32) -> (i32, i32, i32) {
    %c0_i32 = arith.constant 0 : i32
    %c0_i32_0 = arith.constant 0 : i32
    %c0_i32_1 = arith.constant 0 : i32
    return %arg0, %c0_i32, %c0_i32_0 : i32, i32, i32
  }
}

</mosaic_0001>

<bundles_post_ra>
// kernel: tpu_custom_call.1
= control target key start
LH: loop header
LB: loop body
LE: loop exit
PB: predicated region body
PF: predicated region fallthrough
CT: control target
= control target key end

     0   :  { %11 = vsyncpa [#allocation3], 0  ;;  %s1146_s0 = inlined_call_operand.hbm [shape: f32[2,8,4,512], index: 0, kind: input, shape index: {}]   ;;  %s1147_s1 = inlined_call_operand.vmem [shape: f32[8,4], index: 1, kind: input, shape index: {}]   ;;  %s1148_s2 = inlined_call_operand.vmem [shape: f32[8,1], index: 2, kind: input, shape index: {}]   ;;  %s1149_s3 = inlined_call_operand.hbm [shape: f32[2,8,512], index: 3, kind: output, shape index: {0}]   ;;  %s1150_s4 = inlined_call_operand.vmem [shape: f32[2,8,1], index: 4, kind: output, shape index: {1}]   ;;  %s1151_s5 = inlined_call_operand.vmem [shape: f32[2,8,1], index: 5, kind: output, shape index: {2}]  }
   0x1   :  { %13 = vsyncpa [#allocation3 + $0x1], 0 }
   0x2   :  { %14 = vsyncpa [#allocation4], 0 }
   0x3   :  { %16 = vsyncpa [#allocation4 + $0x1], 0  ;;  %s958_s18 = smov 0   ;;  %s960_s19 = smov 0  }
   0x4   :  { %s962_s20 = smov 0   ;;  %s964_s21 = smov 0  }
   0x5   :  { %s966_s22 = smov 0   ;;  %s968_s23 = smov 0  }
   0x6 LB: > { %s715_s24 = sadd.s32 4294967295, %s917_s23   ;;  %s716_s25 = sadd.s32 4294967294, %s917_s23   ;;  %s917_s23 = sphi %s968_s23, %s22_s23   ;;  %s913_s22 = sphi %s966_s22, %s1162_s22   ;;  %s909_s21 = sphi %s964_s21, %s1161_s21   ;;  %s905_s20 = sphi %s962_s20, %s1160_s20   ;;  %s901_s19 = sphi %s960_s19, %s1159_s19   ;;  %s897_s18 = sphi %s958_s18, %s1158_s18  }
   0x7   : > { %s34_s26 = sadd.s32 1, %s913_s22  ;;  %s43_s27 = sadd.s32 1, %s905_s20 }
   0x8   : > { %p36_p0 = scmp.ge.s32.totalorder %s34_s26, 2  ;;  %p50_p1 = scmp.ne.s32.totalorder %s905_s20, %s901_s19 }
   0x9   : > { %p51_p2 = scmp.eq.s32.totalorder %s917_s23, 0  ;;  %p56_p3 = scmp.ne.s32.totalorder %s901_s19, %s897_s18 }
   0xa   : > { %s1164_s26 = smov (%p36_p0, %s34_s26), 0  ;;  %p57_p5 = scmp.eq.s32.totalorder %s715_s24, 0 }
   0xb   : > { %p999_p4 = por %p51_p2, %p50_p1  ;;  %s38_s29 = ssub.s32 %s913_s22, %s1164_s26 }
   0xc   : > { %p124_p6 = scmp.eq.s32.totalorder %s715_s24, 1  ;;  %p41_p7 = scmp.eq.s32.totalorder %s38_s29, 0 }
   0xd   : > { %p1005_p8 = por %p57_p5, %p56_p3  ;;  %p130_p10 = scmp.eq.s32.totalorder %s716_s25, 1 }
   0xe   : > { %p1009_p9 = por %p124_p6, %p50_p1  ;;  %p746_p13 = scmp.lt.s32.totalorder %s917_s23, 2 }
   0xf   : > { %s1014_s7 = scalar_select %p41_p7, %s905_s20, %s43_s27  }
  0x10   : > { %p1016_p11 = por %p130_p10, %p56_p3  ;;  %s208_s9 = sand.u32 1, %s905_s20  }
  0x11   : > { %s719_s10 = sshll.u32 %s208_s9, 7  ;;  %s732_s11 = sshll.u32 %s913_s22, 11 }
  0x12   : > { %s220_s14 = scalar_lea.hbm %s1146_s0, %s732_s11  ;;  %s212_s15 = scalar_lea.vmem [#allocation2], %s719_s10 }
  0x13   : > { %s221_s16 = sshll.u32 %s212_s15, 4  ;;  %p1029_p0 = pnand %p746_p13, %p999_p4  ;;  %s222_s16 = int_to_ptr.vmem [resolvable:$true] %s221_s16 }
  0x14   : > { %p722_p1 = scmp.ge.s32.totalorder %s917_s23, 1  ;;  %s209_s24 = scalar_lea.sflag [#allocation3], %s208_s9 }
  0x15   : > { %p811_p2 = pneg %p1029_p0  ;;  %s822_s25 = scalar_lea.vmem %s222_s16, 2048 }
  0x16   : > { %p823_p3 = scmp.ne.s32.totalorder %s222_s16, %s822_s25  ;;  %s919_s27 = smov [#allocation2]  }
  0x17   : > { %s827_s29 = sshll.u32 %s919_s27, 4  ;;  %s828_s29 = int_to_ptr.vmem [resolvable:$false] %s827_s29 }
  0x18   : > { %p825_p5 = pnand %p823_p3, %p811_p2  ;;  %s829_s10 = scalar_lea.vmem %s828_s29, 4096 }
  0x19   : > { %p830_p7 = scmp.lt.s32.totalorder %s222_s16, %s828_s29  ;;  %p831_p10 = scmp.lt.s32.totalorder %s829_s10, %s822_s25 }
  0x1a   : > { %p826_p6 = pneg %p825_p5 }
  0x1b   : > { %p832_p12 = por %p831_p10, %p830_p7 }
  0x1d   : > { %p833_p4 = pnand %p832_p12, %p826_p6 }
  0x1f   : > { %836 = shalt.err (!%p833_p4)
}
  0x20   : > { %s920_s28 = smov 256   ;;  %s921_s9 = smov 16  }
  0x21   : > { %741 = dma.hbm_to_vmem [thread:$0]  (!%p1029_p0), %s220_s14, 2048, %s222_s16, %s209_s24, %s920_s28, %s920_s28, %s921_s9  }
  0x22   : > { %p229_p13 = scmp.lt.s32.totalorder %s917_s23, 3 }
  0x24   : > { %p230_p2 = pnand %p722_p1, %p229_p13 }
  0x25   : > { %s1042_s11 = sand.u32 (!%p230_p2), 1, %s901_s19  }
  0x26   : > { %233 = sbr.rel (%p230_p2) target bundleno = 336 (0x150), region = 32  ;;  %s723_s12 = sshll.u32 (!%p230_p2), %s1042_s11, 7 }
  0x27   : > { %s236_s13 = scalar_lea.sflag (!%p230_p2), [#allocation3], %s1042_s11  ;;  %s1046_s15 = scalar_lea.vmem (!%p230_p2), [#allocation2], %s723_s12 }
  0x2b   : > { %888 = dma.done.wait (%p1005_p8), %s236_s13, 2048  }
  0x2c   : > { %890 = vsyncadd (%p1005_p8), %s236_s13, 4294965248  ;;  %v922_v0 = vmov 0   ;;  %v923_v1 = vmov 2   ;;  %v321_v2 = vld [vmem:[%s1147_s1] sm:$0xff]  ;;  %v924_v3 = vmov 1   ;;  %v925_v4 = vmov 3  }
  0x2d   : > { %803 = vset.pattern.permute.xlu0 %v922_v0  ;;  %805 = vset.pattern.permute.xlu1 %v923_v1  ;;  %v513_v5 = vld [vmem:[%s1148_s2] sm:$0xff]  ;;  %p276_p8 = scmp.lt.s32.totalorder %s909_s21, 1  ;;  %vm288_vm0 = vcmask 7168   ;;  %v926_v6 = vmov 0.0   ;;  %v292_v8 = vld [vmem:[%s1046_s15 + $0x8] sm:$0xff]  ;;  %v293_v9 = vld [vmem:[%s1046_s15 + $0x10] sm:$0xff]  ;;  %v329_v23 = vlaneseq }
  0x2e   : > { %324 = vperm.xlu0 %803, %v321_v2   ;;  %418 = vperm.xlu1 %805, %v321_v2   ;;  %v291_v7 = vld [vmem:[%s1046_s15] sm:$0xff]  ;;  %v294_v10 = vld [vmem:[%s1046_s15 + $0x18] sm:$0xff]  ;;  %v296_v12 = vld [vmem:[%s1046_s15 + $0x28] sm:$0xff]  ;;  %s724_s28 = sshll.u32 %s1042_s11, 5  ;;  %s733_s14 = sshll.u32 %s909_s21, 9 }
  0x2f   : > { %s1060_s24 = scalar_select %p276_p8, %s909_s21, 1  ;;  %v295_v11 = vld [vmem:[%s1046_s15 + $0x20] sm:$0xff]  ;;  %v297_v13 = vld [vmem:[%s1046_s15 + $0x30] sm:$0xff]  ;;  %v298_v14 = vld [vmem:[%s1046_s15 + $0x38] sm:$0xff]  ;;  %v314_v18 = vmax.f32 %v292_v8, %v296_v12  ;;  %v330_v32 = vshrl.u32 %v329_v23, 7 }
  0x30   : > { %v299_v15 = vld [vmem:[%s1046_s15 + $0x40] sm:$0xff]  ;;  %v307_v16 = vmax.f32 %v291_v7, %v295_v11  ;;  %v308_v17 = vmax.f32 %v293_v9, %v297_v13  ;;  %v315_v19 = vmax.f32 %v294_v10, %v298_v14  ;;  %v300_v20 = vld [vmem:[%s1046_s15 + $0x48] sm:$0xff]  ;;  %v301_v21 = vld [vmem:[%s1046_s15 + $0x50] sm:$0xff]  ;;  %s261_s9 = scalar_lea.vmem [#allocation5], %s724_s28  ;;  %s575_s27 = scalar_lea.hbm %s1149_s3, %s733_s14 }
  0x31   : > { %s725_s25 = sshll.u32 %s1060_s24, 3  ;;  %v302_v22 = vld [vmem:[%s1046_s15 + $0x58] sm:$0xff]  ;;  %v303_v24 = vld [vmem:[%s1046_s15 + $0x60] sm:$0xff]  ;;  %v316_v27 = vmax.f32 %v314_v18, %v300_v20  ;;  %v304_v29 = vld [vmem:[%s1046_s15 + $0x68] sm:$0xff]  ;;  %v331_v37 = vsub.s32 0, %v330_v32  ;;  %v335_v38 = vsub.s32 4, %v330_v32 }
  0x32   : > { %804 = vset.pattern.permute.xlu0 %v924_v3  ;;  %806 = vset.pattern.permute.xlu1 %v925_v4  ;;  %s1068_s10 = scalar_lea.vmem %s1150_s4, %s725_s25  ;;  %v309_v25 = vmax.f32 %v307_v16, %v299_v15  ;;  %v310_v26 = vmax.f32 %v308_v17, %v301_v21  ;;  %v317_v28 = vmax.f32 %v315_v19, %v302_v22  ;;  %v305_v30 = vld [vmem:[%s1046_s15 + $0x70] sm:$0xff]  ;;  %v306_v31 = vld [vmem:[%s1046_s15 + $0x78] sm:$0xff]  ;;  %v423_v41 = vsub.s32 2, %v330_v32  ;;  %s1095_s15 = scalar_lea.vmem %s1151_s5, %s725_s25 }
  0x33   : > { %370 = vperm.xlu0 %804, %v321_v2   ;;  %466 = vperm.xlu1 %806, %v321_v2   ;;  %289 = vst.msk [vmem:[%s1068_s10] sm:$0xff] %vm288_vm0, %v926_v6  ;;  %v318_v35 = vmax.f32 %v316_v27, %v304_v29  ;;  %v427_v42 = vsub.s32 6, %v330_v32  ;;  %v375_v43 = vsub.s32 1, %v330_v32  ;;  %v379_v44 = vsub.s32 5, %v330_v32  ;;  %290 = vst.msk [vmem:[%s1095_s15] sm:$0xff] %vm288_vm0, %v926_v6  ;;  %s577_s16 = sshll.u32 %s261_s9, 4  ;;  %s578_s16 = int_to_ptr.vmem [resolvable:$true] %s577_s16 }
  0x34   : > { %v311_v33 = vmax.f32 %v309_v25, %v303_v24  ;;  %v312_v34 = vmax.f32 %v310_v26, %v305_v30  ;;  %v319_v36 = vmax.f32 %v317_v28, %v306_v31  ;;  %v471_v45 = vsub.s32 3, %v330_v32  ;;  %s553_s29 = scalar_lea.sflag [#allocation4], %s1042_s11  ;;  %s837_s28 = scalar_lea.vmem %s578_s16, 512 }
  0x35   : > { %v475_v46 = vsub.s32 7, %v330_v32  ;;  %p838_p12 = scmp.ne.s32.totalorder %s578_s16, %s837_s28  ;;  %s927_s24 = smov [#allocation5]  }
  0x36   : > { %v313_v39 = vmax.f32 %v311_v33, %v312_v34  ;;  %v320_v40 = vmax.f32 %v318_v35, %v319_v36  ;;  %s841_s25 = sshll.u32 %s927_s24, 4  ;;  %s842_s25 = int_to_ptr.vmem [resolvable:$false] %s841_s25 }
  0x37   : > { %807 = vset.pattern.permute.xlu1 %v922_v0  ;;  %808 = vset.pattern.permute.xlu0 %v922_v0  ;;  %p839_p0 = pnand %p838_p12, %p1009_p9  ;;  %s843_s12 = scalar_lea.vmem %s842_s25, 1024 }
  0x38   : > { %516 = vperm.xlu1 %807, %v513_v5   ;;  %v332_v47 = vrot.slane %v313_v39, %v331_v37  ;;  %v336_v48 = vrot.slane %v313_v39, %v335_v38  ;;  %v340_v49 = vrot.slane %v320_v40, %v331_v37  ;;  %v344_v50 = vrot.slane %v320_v40, %v335_v38  ;;  %p844_p3 = scmp.lt.s32.totalorder %s578_s16, %s842_s25  ;;  %p845_p5 = scmp.lt.s32.totalorder %s843_s12, %s837_s28 }
  0x39   : > { %v424_v51 = vrot.slane %v313_v39, %v423_v41  ;;  %v428_v52 = vrot.slane %v313_v39, %v427_v42  ;;  %v432_v53 = vrot.slane %v320_v40, %v423_v41  ;;  %v436_v54 = vrot.slane %v320_v40, %v427_v42  ;;  %p840_p1 = pneg %p839_p0 }
  0x3a   : > { %v376_v55 = vrot.slane %v313_v39, %v375_v43  ;;  %v380_v56 = vrot.slane %v313_v39, %v379_v44  ;;  %v384_v57 = vrot.slane %v320_v40, %v375_v43  ;;  %v388_v58 = vrot.slane %v320_v40, %v379_v44  ;;  %p846_p6 = por %p845_p5, %p844_p3 }
  0x3b   : > { %v472_v59 = vrot.slane %v313_v39, %v471_v45  ;;  %v476_v60 = vrot.slane %v313_v39, %v475_v46  ;;  %v480_v61 = vrot.slane %v320_v40, %v471_v45  ;;  %v484_v62 = vrot.slane %v320_v40, %v475_v46 }
  0x3c   : > { %v352_v0 = vrot.slane %v332_v47, %v331_v37  ;;  %v356_v1 = vrot.slane %v336_v48, %v331_v37  ;;  %v360_v2 = vrot.slane %v340_v49, %v331_v37  ;;  %v364_v3 = vrot.slane %v344_v50, %v331_v37  ;;  %p847_p7 = pnand %p846_p6, %p840_p1 }
  0x3d   : > { %v444_v5 = vrot.slane %v424_v51, %v423_v41  ;;  %v448_v7 = vrot.slane %v428_v52, %v423_v41  ;;  %v452_v8 = vrot.slane %v432_v53, %v423_v41  ;;  %v456_v9 = vrot.slane %v436_v54, %v423_v41 }
  0x3e   : > { %v396_v10 = vrot.slane %v376_v55, %v375_v43  ;;  %v400_v11 = vrot.slane %v380_v56, %v375_v43  ;;  %v404_v12 = vrot.slane %v384_v57, %v375_v43  ;;  %v408_v13 = vrot.slane %v388_v58, %v375_v43 }
  0x3f   : > { %v492_v14 = vrot.slane %v472_v59, %v471_v45  ;;  %v496_v15 = vrot.slane %v476_v60, %v471_v45  ;;  %v500_v16 = vrot.slane %v480_v61, %v471_v45  ;;  %v504_v17 = vrot.slane %v484_v62, %v471_v45 }
  0xa9   : > { %v325_v63 = vpop.permute.xlu0 %324  ;;  %v419_v4 = vpop.permute.xlu1 %418 }
  0xaa   : > { %v365_v18 = vmul.f32 %v352_v0, %v325_v63  ;;  %v366_v19 = vmul.f32 %v356_v1, %v325_v63  ;;  %v367_v20 = vmul.f32 %v360_v2, %v325_v63  ;;  %v368_v21 = vmul.f32 %v364_v3, %v325_v63 }
  0xab   : > { %v457_v22 = vmul.f32 %v444_v5, %v419_v4  ;;  %v458_v23 = vmul.f32 %v448_v7, %v419_v4  ;;  %v459_v24 = vmul.f32 %v452_v8, %v419_v4  ;;  %v460_v25 = vmul.f32 %v456_v9, %v419_v4 }
  0xae   : > { %v371_v26 = vpop.permute.xlu0 %370  ;;  %v467_v27 = vpop.permute.xlu1 %466 }
  0xaf   : > { %v409_v28 = vmul.f32 %v396_v10, %v371_v26  ;;  %v410_v29 = vmul.f32 %v400_v11, %v371_v26  ;;  %v411_v30 = vmul.f32 %v404_v12, %v371_v26  ;;  %v412_v31 = vmul.f32 %v408_v13, %v371_v26 }
  0xb0   : > { %v505_v32 = vmul.f32 %v492_v14, %v467_v27  ;;  %v506_v33 = vmul.f32 %v496_v15, %v467_v27  ;;  %v507_v34 = vmul.f32 %v500_v16, %v467_v27  ;;  %v508_v35 = vmul.f32 %v504_v17, %v467_v27 }
  0xb1   : > { %v413_v36 = vadd.f32 %v409_v28, %v365_v18  ;;  %v414_v37 = vadd.f32 %v410_v29, %v366_v19  ;;  %v415_v38 = vadd.f32 %v411_v30, %v367_v20  ;;  %v416_v39 = vadd.f32 %v412_v31, %v368_v21 }
  0xb3   : > { %v461_v40 = vadd.f32 %v457_v22, %v413_v36  ;;  %v462_v41 = vadd.f32 %v458_v23, %v414_v37  ;;  %v463_v42 = vadd.f32 %v459_v24, %v415_v38  ;;  %v464_v43 = vadd.f32 %v460_v25, %v416_v39  ;;  %v517_v44 = vpop.permute.xlu1 %516 }
  0xb5   : > { %v509_v45 = vadd.f32 %v505_v32, %v461_v40  ;;  %v510_v46 = vadd.f32 %v506_v33, %v462_v41  ;;  %v511_v47 = vadd.f32 %v507_v34, %v463_v42  ;;  %v512_v48 = vadd.f32 %v508_v35, %v464_v43 }
  0xb7   : > { %v519_v49 = vadd.f32 %v517_v44, %v509_v45  ;;  %v520_v50 = vadd.f32 %v517_v44, %v510_v46  ;;  %v521_v51 = vadd.f32 %v517_v44, %v511_v47  ;;  %v522_v52 = vadd.f32 %v517_v44, %v512_v48 }
  0xb9   : > { %v523_v53 = vmax.f32 %v519_v49, 0.0  ;;  %v524_v54 = vmax.f32 %v520_v50, 0.0  ;;  %v525_v55 = vmax.f32 %v521_v51, 0.0  ;;  %v526_v56 = vmax.f32 %v522_v52, 0.0 }
  0xbb   : > { %527 = vst [vmem:[%s261_s9] sm:$0xff] %v523_v53  ;;  %528 = vst [vmem:[%s261_s9 + $0x8] sm:$0xff] %v524_v54  ;;  %v532_v57 = vadd.f32 %v524_v54, %v523_v53  ;;  %v541_v58 = vmul.f32 %v523_v53, %v523_v53  ;;  %v542_v59 = vmul.f32 %v524_v54, %v524_v54 }
  0xbc   : > { %529 = vst [vmem:[%s261_s9 + $0x10] sm:$0xff] %v525_v55  ;;  %530 = vst [vmem:[%s261_s9 + $0x18] sm:$0xff] %v526_v56  ;;  %v543_v61 = vmul.f32 %v525_v55, %v525_v55  ;;  %v544_v0 = vmul.f32 %v526_v56, %v526_v56 }
  0xbd   : > { %v533_v60 = vadd.f32 %v532_v57, %v525_v55  ;;  %v545_v62 = vadd.f32 %v542_v59, %v541_v58 }
  0xbf   : > { %v534_v63 = vadd.f32 %v533_v60, %v526_v56  ;;  %v546_v1 = vadd.f32 %v545_v62, %v543_v61 }
  0xc1   : > { %535 = vadd.xlane.f32.xlu0 %v534_v63  ;;  %v547_v2 = vadd.f32 %v546_v1, %v544_v0 }
  0xc3   : > { %548 = vadd.xlane.f32.xlu1 %v547_v2 }
  0xc4   : > { %850 = shalt.err (!%p847_p7)
}
  0xc5   : > { %s851_s21 = scalar_lea.hbm %s575_s27, 512  ;;  %s855_s13 = scalar_lea.hbm %s1149_s3, 1024 }
  0xc6   : > { %p852_p10 = scmp.ne.s32.totalorder %s575_s27, %s851_s21  ;;  %p856_p2 = scmp.lt.s32.totalorder %s575_s27, %s1149_s3 }
  0xc7   : > { %p857_p8 = scmp.lt.s32.totalorder %s855_s13, %s851_s21 }
  0xc8   : > { %p853_p4 = pnand %p852_p10, %p1009_p9 }
  0xc9   : > { %p858_p12 = por %p857_p8, %p856_p2 }
  0xca   : > { %p854_p13 = pneg %p853_p4 }
  0xcc   : > { %p859_p0 = pnand %p858_p12, %p854_p13 }
  0xce   : > { %862 = shalt.err (!%p859_p0)
}
  0xcf   : > { %736 = dma.vmem_to_hbm [thread:$0]  (%p1009_p9), %s578_s16, 512, %s575_s27, %s553_s29   ;;  %v531_v6 = vld [vmem:[%s1068_s10] sm:$0xff] }
  0xd0   : > { %v540_v4 = vld [vmem:[%s1095_s15] sm:$0xff] }
 0x14a   : > { %v536_v3 = vpop.xlane.xlu0 %535 }
 0x14b   : > { %v537_v5 = vadd.f32 %v536_v3, %v531_v6 }
 0x14c   : > { %v549_v7 = vpop.xlane.xlu1 %548 }
 0x14d   : > { %539 = vst.msk [vmem:[%s1068_s10] sm:$0xff] %vm288_vm0, %v537_v5  ;;  %v550_v8 = vadd.f32 %v549_v7, %v540_v4 }
 0x14f   : > { %551 = vst.msk [vmem:[%s1095_s15] sm:$0xff] %vm288_vm0, %v550_v8 }
 0x150 PF: > { %s595_s6 = sand.u32 1, %s897_s18   ;;  %p1157_p1 = scmp.ge.s32.totalorder %s917_s23, 2 }
 0x151   : > { %s596_s16 = scalar_lea.sflag [#allocation4], %s595_s6 }
 0x152   : > { %p743_p3 = pnand %p1157_p1, %p1016_p11 }
 0x154   : > { %p744_p5 = pneg %p743_p3 }
 0x156   : > { %892 = dma.done.wait (%p744_p5), %s596_s16, 512  }
 0x157   : > { %894 = vsyncadd (%p744_p5), %s596_s16, 4294966784  ;;  %s22_s23 = sadd.s32 1, %s917_s23   ;;  %s1158_s18 = smov %s901_s19 }
 0x158   : > { %p19_p9 = scmp.ge.s32.totalorder %s22_s23, 4   ;;  %s1159_s19 = smov %s905_s20 }
 0x159   : > { %s1160_s20 = smov %s1014_s7  ;;  %s1161_s21 = smov %s913_s22 }
 0x15a   : > { %s1162_s22 = smov %s1164_s26  ;;  %21 = sbr.rel (!%p19_p9) target bundleno = 6 (0x6), region = 105 }
 0x15f   :  { %615 = vsyncpa [#allocation3], 1 }
 0x160   :  { %617 = vsyncpa [#allocation3 + $0x1], 1 }
 0x161   :  { %618 = vsyncpa [#allocation4], 1 }
 0x162   :  { %620 = vsyncpa [#allocation4 + $0x1], 1 }

</bundles_post_ra>
